<compile_context>
chip_gen: v7x
topology: tpu7x:2x2x1
jax: 0.10.0
libtpu: 0.0.40
codegen_flags: <defaults>
</compile_context>

<pallas_src>
import numpy as np
import jax
import jax.numpy as jnp
from jax.experimental import pallas as pl
from jax.experimental.pallas import tpu as pltpu


def _round_up(x, m):
    return ((x + m - 1) // m) * m


def _make_alphas(pooled_height, pooled_width, iy_upper, ix_upper,
                 roi_bin_grid_h, roi_bin_grid_w, num_pad):
    """Compile-time (2, num_pad) table of normalized sample offsets.

    alpha_y[n] = ph + (iy + 0.5) / roi_bin_grid_h
    alpha_x[n] = pw + (ix + 0.5) / roi_bin_grid_w
    with flat index n enumerating (ph, pw, iy, ix), ix fastest — exactly the
    PyTorch nested-loop order.  Then
        yy = roi_start_h + bin_size_h * alpha_y
        xx = roi_start_w + bin_size_w * alpha_x.
    Lanes >= num are zero padding (ignored by consumers).
    """
    ph, pw, iy, ix = np.meshgrid(
        np.arange(pooled_height), np.arange(pooled_width),
        np.arange(iy_upper), np.arange(ix_upper), indexing="ij")
    alpha_y = (ph + (iy + 0.5) / roi_bin_grid_h).reshape(-1)
    alpha_x = (pw + (ix + 0.5) / roi_bin_grid_w).reshape(-1)
    num = alpha_y.shape[0]
    out = np.zeros((2, num_pad), dtype=np.float32)
    out[0, :num] = alpha_y
    out[1, :num] = alpha_x
    return out


def _make_precalc_kernel(height, width):
    h_f = float(height)
    w_f = float(width)
    h_m1 = height - 1
    w_m1 = width - 1

    def kernel(params_ref, alphas_ref, idx_ref, w_ref):
        # params_ref: (R_block, 4)          f32 [roi_start_h, roi_start_w, bin_size_h, bin_size_w]
        # alphas_ref: (2, num_pad)          f32 constant sample-offset table
        # idx_ref:    (4, R_block, num_pad) i32 flat gather positions [ll, lh, hl, hh]
        # w_ref:      (4, R_block, num_pad) f32 bilinear weights      [w1, w2, w3, w4]
        roi_start_h = params_ref[:, 0:1]          # (R, 1)
        roi_start_w = params_ref[:, 1:2]
        bin_size_h = params_ref[:, 2:3]
        bin_size_w = params_ref[:, 3:4]

        alpha_y = alphas_ref[0:1, :]              # (1, num_pad)
        alpha_x = alphas_ref[1:2, :]

        yy = roi_start_h + bin_size_h * alpha_y   # (R, num_pad) full-sublane operands
        xx = roi_start_w + bin_size_w * alpha_x

        valid = jnp.logical_not((yy < -1.0) | (yy > h_f)
                                | (xx < -1.0) | (xx > w_f))

        y = jnp.maximum(yy, 0.0)
        x = jnp.maximum(xx, 0.0)

        y_low = y.astype(jnp.int32)   # trunc == floor since y >= 0
        x_low = x.astype(jnp.int32)

        y_clamp = y_low >= h_m1
        y_high = jnp.where(y_clamp, h_m1, y_low + 1)
        y_low = jnp.where(y_clamp, h_m1, y_low)
        y = jnp.where(y_clamp, y_low.astype(jnp.float32), y)

        x_clamp = x_low >= w_m1
        x_high = jnp.where(x_clamp, w_m1, x_low + 1)
        x_low = jnp.where(x_clamp, w_m1, x_low)
        x = jnp.where(x_clamp, x_low.astype(jnp.float32), x)

        ly = y - y_low.astype(jnp.float32)
        lx = x - x_low.astype(jnp.float32)
        hy = 1.0 - ly
        hx = 1.0 - lx

        # 8 dense (R_block, num_pad) stores; invalid samples zeroed in place.
        idx_ref[0] = jnp.where(valid, y_low * width + x_low, 0)
        idx_ref[1] = jnp.where(valid, y_low * width + x_high, 0)
        idx_ref[2] = jnp.where(valid, y_high * width + x_low, 0)
        idx_ref[3] = jnp.where(valid, y_high * width + x_high, 0)

        w_ref[0] = jnp.where(valid, hy * hx, 0.0)
        w_ref[1] = jnp.where(valid, hy * lx, 0.0)
        w_ref[2] = jnp.where(valid, ly * hx, 0.0)
        w_ref[3] = jnp.where(valid, ly * lx, 0.0)

    return kernel


def bilinear_interpolate_precalc_batched(roi_params, height, width, *,
                                         pooled_height=7, pooled_width=7,
                                         iy_upper=2, ix_upper=2,
                                         roi_bin_grid_h=2, roi_bin_grid_w=2,
                                         r_block=256):
    """roi_params: (n_rois, 4) f32 rows of
       [roi_start_h, roi_start_w, bin_size_h, bin_size_w].

    Returns (idx_slab, w_slab) in the canonical lane/sublane-dense kernel layout:
      idx_slab: (4, n_pad, num_pad) int32   rows = [ll, lh, hl, hh] flat positions
      w_slab:   (4, n_pad, num_pad) float32 rows = [w1, w2, w3, w4]
    ROI rows >= n_rois and sample lanes >= num are padding.  Downstream ROIAlign
    gather should consume this layout directly (no transpose needed).
    """
    roi_params = jnp.asarray(roi_params, dtype=jnp.float32)
    n_rois = roi_params.shape[0]
    num = pooled_height * pooled_width * iy_upper * ix_upper
    num_pad = max(128, _round_up(num, 128))

    r_block = max(8, min(_round_up(r_block, 8), _round_up(n_rois, 8)))
    n_pad = _round_up(n_rois, r_block)
    if n_pad != n_rois:
        roi_params = jnp.pad(roi_params, ((0, n_pad - n_rois), (0, 0)))

    alphas = jnp.asarray(_make_alphas(pooled_height, pooled_width, iy_upper,
                                      ix_upper, roi_bin_grid_h, roi_bin_grid_w,
                                      num_pad))
    kernel = _make_precalc_kernel(height, width)

    idx_slab, w_slab = pl.pallas_call(
        kernel,
        out_shape=(jax.ShapeDtypeStruct((4, n_pad, num_pad), jnp.int32),
                   jax.ShapeDtypeStruct((4, n_pad, num_pad), jnp.float32)),
        grid_spec=pltpu.PrefetchScalarGridSpec(
            num_scalar_prefetch=0,
            grid=(n_pad // r_block,),
            in_specs=[pl.BlockSpec((r_block, 4), lambda r: (r, 0)),
                      pl.BlockSpec((2, num_pad), lambda r: (0, 0))],
            out_specs=(pl.BlockSpec((4, r_block, num_pad), lambda r: (0, r, 0)),
                       pl.BlockSpec((4, r_block, num_pad), lambda r: (0, r, 0))),
        ),
        compiler_params=pltpu.CompilerParams(
            dimension_semantics=("parallel",)),
    )(roi_params, alphas)
    return idx_slab, w_slab


def bilinear_interpolate_precalc(height, width, *, pooled_height=7,
                                 pooled_width=7, iy_upper=2, ix_upper=2,
                                 roi_start_h=0.0, roi_start_w=0.0,
                                 bin_size_h=1.0, bin_size_w=1.0,
                                 roi_bin_grid_h=2, roi_bin_grid_w=2):
    """Module-equivalent single-ROI forward: returns the (num, 8) pre_calc table."""
    params = jnp.array([[roi_start_h, roi_start_w, bin_size_h, bin_size_w]],
                       dtype=jnp.float32)
    idx_slab, w_slab = bilinear_interpolate_precalc_batched(
        params, height, width,
        pooled_height=pooled_height, pooled_width=pooled_width,
        iy_upper=iy_upper, ix_upper=ix_upper,
        roi_bin_grid_h=roi_bin_grid_h, roi_bin_grid_w=roi_bin_grid_w)
    num = pooled_height * pooled_width * iy_upper * ix_upper
    # Tiny layout shim back to the original module's (num, 8) float table —
    # deliberately outside the kernel (a (num, 8) store would be an 8-lane
    # masked partial store).
    pre = jnp.concatenate([idx_slab[:, 0, :num].astype(jnp.float32),
                           w_slab[:, 0, :num]], axis=0)
    return pre.T


def reference_precalc(height, width, pooled_height, pooled_width, iy_upper,
                      ix_upper, roi_start_h, roi_start_w, bin_size_h,
                      bin_size_w, roi_bin_grid_h, roi_bin_grid_w):
    """Pure-python port of the PyTorch forward (all-valid case)."""
    num = pooled_height * pooled_width * iy_upper * ix_upper
    out = np.zeros((num, 8), dtype=np.float32)
    idx = 0
    for ph in range(pooled_height):
        for pw in range(pooled_width):
            for iy in range(iy_upper):
                yy = roi_start_h + ph * bin_size_h + (iy + 0.5) * bin_size_h / roi_bin_grid_h
                for ix in range(ix_upper):
                    xx = roi_start_w + pw * bin_size_w + (ix + 0.5) * bin_size_w / roi_bin_grid_w
                    x, y = xx, yy
                    if y < -1.0 or y > height or x < -1.0 or x > width:
                        out[idx, :] = 0
                        continue
                    y = max(y, 0.0)
                    x = max(x, 0.0)
                    y_low = int(y)
                    x_low = int(x)
                    if y_low >= height - 1:
                        y_high = y_low = height - 1
                        y = float(y_low)
                    else:
                        y_high = y_low + 1
                    if x_low >= width - 1:
                        x_high = x_low = width - 1
                        x = float(x_low)
                    else:
                        x_high = x_low + 1
                    ly = y - y_low
                    lx = x - x_low
                    hy, hx = 1.0 - ly, 1.0 - lx
                    out[idx] = [y_low * width + x_low, y_low * width + x_high,
                                y_high * width + x_low, y_high * width + x_high,
                                hy * hx, hy * lx, ly * hx, ly * lx]
                    idx += 1
    return out


if __name__ == "__main__":
    key = jax.random.PRNGKey(0)
    k_data, k_start, k_size = jax.random.split(key, 3)

    # stand-in for torch.load('input.pt'): only H, W of an NCHW tensor are used
    bottom_data = jax.random.normal(k_data, (2, 4, 16, 16), dtype=jnp.float32)
    height = bottom_data.shape[2]
    width = bottom_data.shape[3]

    cfg = dict(pooled_height=7, pooled_width=7, iy_upper=2, ix_upper=2,
               roi_bin_grid_h=2, roi_bin_grid_w=2)
    num = cfg["pooled_height"] * cfg["pooled_width"] * cfg["iy_upper"] * cfg["ix_upper"]

    # Batched path: many ROIs in one pallas_call, R_block ROIs per grid step.
    # Params are quantized to multiples of 1/32 so the f32 kernel and the f64
    # reference compute bit-identical sample coordinates (no floor-boundary flips),
    # and are kept in range so every sample is valid (see compaction TODO).
    n_rois = 37
    starts = jnp.round(jax.random.uniform(k_start, (n_rois, 2),
                                          minval=-0.5, maxval=2.0) * 32.0) / 32.0
    sizes = jnp.round(jax.random.uniform(k_size, (n_rois, 2),
                                         minval=0.3, maxval=2.0) * 32.0) / 32.0
    roi_params = jnp.concatenate([starts, sizes], axis=1).astype(jnp.float32)
    # ROI 0 = the module's own single-ROI configuration.
    roi_params = roi_params.at[0].set(
        jnp.array([0.25, 1.0, 1.875, 1.75], dtype=jnp.float32))

    idx_slab, w_slab = bilinear_interpolate_precalc_batched(
        roi_params, height, width, **cfg)
    idx_slab, w_slab = jax.block_until_ready((idx_slab, w_slab))

    roi_params_np = np.asarray(roi_params)
    idx_np = np.asarray(idx_slab)
    w_np = np.asarray(w_slab)
    for i in range(n_rois):
        rsh, rsw, bsh, bsw = (float(v) for v in roi_params_np[i])
        ref = reference_precalc(height, width, cfg["pooled_height"],
                                cfg["pooled_width"], cfg["iy_upper"],
                                cfg["ix_upper"], rsh, rsw, bsh, bsw,
                                cfg["roi_bin_grid_h"], cfg["roi_bin_grid_w"])
        got = np.concatenate([idx_np[:, i, :num].astype(np.float32),
                              w_np[:, i, :num]], axis=0).T
        np.testing.assert_allclose(got, ref, rtol=1e-5, atol=1e-5)

    # Module-equivalent single-ROI forward (original nn.Module returns (num, 8)).
    single = bilinear_interpolate_precalc(
        height, width, roi_start_h=0.25, roi_start_w=1.0,
        bin_size_h=1.875, bin_size_w=1.75, **cfg)
    single = jax.block_until_ready(single)
    ref0 = reference_precalc(height, width, cfg["pooled_height"],
                             cfg["pooled_width"], cfg["iy_upper"],
                             cfg["ix_upper"], 0.25, 1.0, 1.875, 1.75,
                             cfg["roi_bin_grid_h"], cfg["roi_bin_grid_w"])
    np.testing.assert_allclose(np.asarray(single), ref0, rtol=1e-5, atol=1e-5)

    print("KERNEL_OK")
</pallas_src>

<mosaic_0001>
module attributes {stable_mosaic.version = 11 : i64} {
  func.func @kernel(%arg0: i32, %arg1: memref<40x4xf32, #tpu.memory_space<vmem>>, %arg2: memref<2x256xf32, #tpu.memory_space<vmem>>, %arg3: memref<4x40x256xi32, #tpu.memory_space<vmem>>, %arg4: memref<4x40x256xf32, #tpu.memory_space<vmem>>) attributes {dimension_semantics = [#tpu.dimension_semantics<parallel>], iteration_bounds = array<i64: 1>, scalar_prefetch = 0 : i64, scratch_operands = 0 : i64, tpu.core_type = #tpu.core_type<tc>, window_params = [{transform_indices = @transform_0, window_bounds = array<i64: 40, 4>}, {pipeline_mode = #tpu.pipeline_mode<synchronous>, transform_indices = @transform_1, window_bounds = array<i64: 2, 256>}, {transform_indices = @transform_2, window_bounds = array<i64: 4, 40, 256>}, {transform_indices = @transform_3, window_bounds = array<i64: 4, 40, 256>}]} {
    %c0 = arith.constant 0 : index
    %c0_0 = arith.constant 0 : index
    %0 = vector.load %arg1[%c0, %c0_0] : memref<40x4xf32, #tpu.memory_space<vmem>>, vector<40x1xf32>
    %c0_1 = arith.constant 0 : index
    %c1 = arith.constant 1 : index
    %1 = vector.load %arg1[%c0_1, %c1] : memref<40x4xf32, #tpu.memory_space<vmem>>, vector<40x1xf32>
    %c0_2 = arith.constant 0 : index
    %c2 = arith.constant 2 : index
    %2 = vector.load %arg1[%c0_2, %c2] : memref<40x4xf32, #tpu.memory_space<vmem>>, vector<40x1xf32>
    %c0_3 = arith.constant 0 : index
    %c3 = arith.constant 3 : index
    %3 = vector.load %arg1[%c0_3, %c3] : memref<40x4xf32, #tpu.memory_space<vmem>>, vector<40x1xf32>
    %c0_4 = arith.constant 0 : index
    %c0_5 = arith.constant 0 : index
    %4 = vector.load %arg2[%c0_4, %c0_5] : memref<2x256xf32, #tpu.memory_space<vmem>>, vector<1x256xf32>
    %c1_6 = arith.constant 1 : index
    %c0_7 = arith.constant 0 : index
    %5 = vector.load %arg2[%c1_6, %c0_7] : memref<2x256xf32, #tpu.memory_space<vmem>>, vector<1x256xf32>
    %6 = vector.broadcast %2 : vector<40x1xf32> to vector<40x256xf32>
    %7 = vector.broadcast %4 : vector<1x256xf32> to vector<40x256xf32>
    %8 = arith.mulf %6, %7 : vector<40x256xf32>
    %9 = vector.broadcast %0 : vector<40x1xf32> to vector<40x256xf32>
    %10 = arith.addf %9, %8 : vector<40x256xf32>
    %11 = vector.broadcast %3 : vector<40x1xf32> to vector<40x256xf32>
    %12 = vector.broadcast %5 : vector<1x256xf32> to vector<40x256xf32>
    %13 = arith.mulf %11, %12 : vector<40x256xf32>
    %14 = vector.broadcast %1 : vector<40x1xf32> to vector<40x256xf32>
    %15 = arith.addf %14, %13 : vector<40x256xf32>
    %cst = arith.constant -1.000000e+00 : f32
    %16 = vector.broadcast %cst : f32 to vector<40x256xf32>
    %17 = arith.cmpf olt, %10, %16 : vector<40x256xf32>
    %cst_8 = arith.constant 1.600000e+01 : f32
    %18 = vector.broadcast %cst_8 : f32 to vector<40x256xf32>
    %19 = arith.cmpf ogt, %10, %18 : vector<40x256xf32>
    %20 = arith.ori %17, %19 : vector<40x256xi1>
    %cst_9 = arith.constant -1.000000e+00 : f32
    %21 = vector.broadcast %cst_9 : f32 to vector<40x256xf32>
    %22 = arith.cmpf olt, %15, %21 : vector<40x256xf32>
    %23 = arith.ori %20, %22 : vector<40x256xi1>
    %cst_10 = arith.constant 1.600000e+01 : f32
    %24 = vector.broadcast %cst_10 : f32 to vector<40x256xf32>
    %25 = arith.cmpf ogt, %15, %24 : vector<40x256xf32>
    %26 = arith.ori %23, %25 : vector<40x256xi1>
    %cst_11 = arith.constant dense<true> : vector<40x256xi1>
    %27 = arith.xori %26, %cst_11 : vector<40x256xi1>
    %cst_12 = arith.constant 0.000000e+00 : f32
    %28 = vector.broadcast %cst_12 : f32 to vector<40x256xf32>
    %29 = arith.maximumf %10, %28 : vector<40x256xf32>
    %cst_13 = arith.constant 0.000000e+00 : f32
    %30 = vector.broadcast %cst_13 : f32 to vector<40x256xf32>
    %31 = arith.maximumf %15, %30 : vector<40x256xf32>
    %32 = arith.fptosi %29 : vector<40x256xf32> to vector<40x256xi32>
    %33 = arith.fptosi %31 : vector<40x256xf32> to vector<40x256xi32>
    %c15_i32 = arith.constant 15 : i32
    %34 = vector.broadcast %c15_i32 : i32 to vector<40x256xi32>
    %35 = arith.cmpi sge, %32, %34 : vector<40x256xi32>
    %c1_i32 = arith.constant 1 : i32
    %36 = vector.broadcast %c1_i32 : i32 to vector<40x256xi32>
    %37 = arith.addi %32, %36 : vector<40x256xi32>
    %c15_i32_14 = arith.constant 15 : i32
    %38 = vector.broadcast %c15_i32_14 : i32 to vector<40x256xi32>
    %39 = arith.select %35, %38, %37 : vector<40x256xi1>, vector<40x256xi32>
    %c15_i32_15 = arith.constant 15 : i32
    %40 = vector.broadcast %c15_i32_15 : i32 to vector<40x256xi32>
    %41 = arith.select %35, %40, %32 : vector<40x256xi1>, vector<40x256xi32>
    %42 = arith.sitofp %41 : vector<40x256xi32> to vector<40x256xf32>
    %43 = arith.select %35, %42, %29 : vector<40x256xi1>, vector<40x256xf32>
    %c15_i32_16 = arith.constant 15 : i32
    %44 = vector.broadcast %c15_i32_16 : i32 to vector<40x256xi32>
    %45 = arith.cmpi sge, %33, %44 : vector<40x256xi32>
    %c1_i32_17 = arith.constant 1 : i32
    %46 = vector.broadcast %c1_i32_17 : i32 to vector<40x256xi32>
    %47 = arith.addi %33, %46 : vector<40x256xi32>
    %c15_i32_18 = arith.constant 15 : i32
    %48 = vector.broadcast %c15_i32_18 : i32 to vector<40x256xi32>
    %49 = arith.select %45, %48, %47 : vector<40x256xi1>, vector<40x256xi32>
    %c15_i32_19 = arith.constant 15 : i32
    %50 = vector.broadcast %c15_i32_19 : i32 to vector<40x256xi32>
    %51 = arith.select %45, %50, %33 : vector<40x256xi1>, vector<40x256xi32>
    %52 = arith.sitofp %51 : vector<40x256xi32> to vector<40x256xf32>
    %53 = arith.select %45, %52, %31 : vector<40x256xi1>, vector<40x256xf32>
    %54 = arith.sitofp %41 : vector<40x256xi32> to vector<40x256xf32>
    %55 = arith.subf %43, %54 : vector<40x256xf32>
    %56 = arith.sitofp %51 : vector<40x256xi32> to vector<40x256xf32>
    %57 = arith.subf %53, %56 : vector<40x256xf32>
    %cst_20 = arith.constant 1.000000e+00 : f32
    %58 = vector.broadcast %cst_20 : f32 to vector<40x256xf32>
    %59 = arith.subf %58, %55 : vector<40x256xf32>
    %cst_21 = arith.constant 1.000000e+00 : f32
    %60 = vector.broadcast %cst_21 : f32 to vector<40x256xf32>
    %61 = arith.subf %60, %57 : vector<40x256xf32>
    %c16_i32 = arith.constant 16 : i32
    %62 = vector.broadcast %c16_i32 : i32 to vector<40x256xi32>
    %63 = arith.muli %41, %62 : vector<40x256xi32>
    %64 = arith.addi %63, %51 : vector<40x256xi32>
    %c0_i32 = arith.constant 0 : i32
    %65 = vector.broadcast %c0_i32 : i32 to vector<40x256xi32>
    %66 = arith.select %27, %64, %65 : vector<40x256xi1>, vector<40x256xi32>
    %c0_22 = arith.constant 0 : index
    %c0_23 = arith.constant 0 : index
    %c0_24 = arith.constant 0 : index
    %67 = vector.load %arg3[%c0_22, %c0_23, %c0_24] : memref<4x40x256xi32, #tpu.memory_space<vmem>>, vector<1x40x256xi32>
    %68 = vector.shape_cast %67 : vector<1x40x256xi32> to vector<40x256xi32>
    %69 = vector.shape_cast %66 : vector<40x256xi32> to vector<1x40x256xi32>
    tpu.vector_store %arg3[%c0_22, %c0_23, %c0_24], %69 {strides = array<i32>} : memref<4x40x256xi32, #tpu.memory_space<vmem>>, vector<1x40x256xi32>,
    %c16_i32_25 = arith.constant 16 : i32
    %70 = vector.broadcast %c16_i32_25 : i32 to vector<40x256xi32>
    %71 = arith.muli %41, %70 : vector<40x256xi32>
    %72 = arith.addi %71, %49 : vector<40x256xi32>
    %c0_i32_26 = arith.constant 0 : i32
    %73 = vector.broadcast %c0_i32_26 : i32 to vector<40x256xi32>
    %74 = arith.select %27, %72, %73 : vector<40x256xi1>, vector<40x256xi32>
    %c1_27 = arith.constant 1 : index
    %c0_28 = arith.constant 0 : index
    %c0_29 = arith.constant 0 : index
    %75 = vector.load %arg3[%c1_27, %c0_28, %c0_29] : memref<4x40x256xi32, #tpu.memory_space<vmem>>, vector<1x40x256xi32>
    %76 = vector.shape_cast %75 : vector<1x40x256xi32> to vector<40x256xi32>
    %77 = vector.shape_cast %74 : vector<40x256xi32> to vector<1x40x256xi32>
    tpu.vector_store %arg3[%c1_27, %c0_28, %c0_29], %77 {strides = array<i32>} : memref<4x40x256xi32, #tpu.memory_space<vmem>>, vector<1x40x256xi32>,
    %c16_i32_30 = arith.constant 16 : i32
    %78 = vector.broadcast %c16_i32_30 : i32 to vector<40x256xi32>
    %79 = arith.muli %39, %78 : vector<40x256xi32>
    %80 = arith.addi %79, %51 : vector<40x256xi32>
    %c0_i32_31 = arith.constant 0 : i32
    %81 = vector.broadcast %c0_i32_31 : i32 to vector<40x256xi32>
    %82 = arith.select %27, %80, %81 : vector<40x256xi1>, vector<40x256xi32>
    %c2_32 = arith.constant 2 : index
    %c0_33 = arith.constant 0 : index
    %c0_34 = arith.constant 0 : index
    %83 = vector.load %arg3[%c2_32, %c0_33, %c0_34] : memref<4x40x256xi32, #tpu.memory_space<vmem>>, vector<1x40x256xi32>
    %84 = vector.shape_cast %83 : vector<1x40x256xi32> to vector<40x256xi32>
    %85 = vector.shape_cast %82 : vector<40x256xi32> to vector<1x40x256xi32>
    tpu.vector_store %arg3[%c2_32, %c0_33, %c0_34], %85 {strides = array<i32>} : memref<4x40x256xi32, #tpu.memory_space<vmem>>, vector<1x40x256xi32>,
    %c16_i32_35 = arith.constant 16 : i32
    %86 = vector.broadcast %c16_i32_35 : i32 to vector<40x256xi32>
    %87 = arith.muli %39, %86 : vector<40x256xi32>
    %88 = arith.addi %87, %49 : vector<40x256xi32>
    %c0_i32_36 = arith.constant 0 : i32
    %89 = vector.broadcast %c0_i32_36 : i32 to vector<40x256xi32>
    %90 = arith.select %27, %88, %89 : vector<40x256xi1>, vector<40x256xi32>
    %c3_37 = arith.constant 3 : index
    %c0_38 = arith.constant 0 : index
    %c0_39 = arith.constant 0 : index
    %91 = vector.load %arg3[%c3_37, %c0_38, %c0_39] : memref<4x40x256xi32, #tpu.memory_space<vmem>>, vector<1x40x256xi32>
    %92 = vector.shape_cast %91 : vector<1x40x256xi32> to vector<40x256xi32>
    %93 = vector.shape_cast %90 : vector<40x256xi32> to vector<1x40x256xi32>
    tpu.vector_store %arg3[%c3_37, %c0_38, %c0_39], %93 {strides = array<i32>} : memref<4x40x256xi32, #tpu.memory_space<vmem>>, vector<1x40x256xi32>,
    %94 = arith.mulf %59, %61 : vector<40x256xf32>
    %cst_40 = arith.constant 0.000000e+00 : f32
    %95 = vector.broadcast %cst_40 : f32 to vector<40x256xf32>
    %96 = arith.select %27, %94, %95 : vector<40x256xi1>, vector<40x256xf32>
    %c0_41 = arith.constant 0 : index
    %c0_42 = arith.constant 0 : index
    %c0_43 = arith.constant 0 : index
    %97 = vector.load %arg4[%c0_41, %c0_42, %c0_43] : memref<4x40x256xf32, #tpu.memory_space<vmem>>, vector<1x40x256xf32>
    %98 = vector.shape_cast %97 : vector<1x40x256xf32> to vector<40x256xf32>
    %99 = vector.shape_cast %96 : vector<40x256xf32> to vector<1x40x256xf32>
    tpu.vector_store %arg4[%c0_41, %c0_42, %c0_43], %99 {strides = array<i32>} : memref<4x40x256xf32, #tpu.memory_space<vmem>>, vector<1x40x256xf32>,
    %100 = arith.mulf %59, %57 : vector<40x256xf32>
    %cst_44 = arith.constant 0.000000e+00 : f32
    %101 = vector.broadcast %cst_44 : f32 to vector<40x256xf32>
    %102 = arith.select %27, %100, %101 : vector<40x256xi1>, vector<40x256xf32>
    %c1_45 = arith.constant 1 : index
    %c0_46 = arith.constant 0 : index
    %c0_47 = arith.constant 0 : index
    %103 = vector.load %arg4[%c1_45, %c0_46, %c0_47] : memref<4x40x256xf32, #tpu.memory_space<vmem>>, vector<1x40x256xf32>
    %104 = vector.shape_cast %103 : vector<1x40x256xf32> to vector<40x256xf32>
    %105 = vector.shape_cast %102 : vector<40x256xf32> to vector<1x40x256xf32>
    tpu.vector_store %arg4[%c1_45, %c0_46, %c0_47], %105 {strides = array<i32>} : memref<4x40x256xf32, #tpu.memory_space<vmem>>, vector<1x40x256xf32>,
    %106 = arith.mulf %55, %61 : vector<40x256xf32>
    %cst_48 = arith.constant 0.000000e+00 : f32
    %107 = vector.broadcast %cst_48 : f32 to vector<40x256xf32>
    %108 = arith.select %27, %106, %107 : vector<40x256xi1>, vector<40x256xf32>
    %c2_49 = arith.constant 2 : index
    %c0_50 = arith.constant 0 : index
    %c0_51 = arith.constant 0 : index
    %109 = vector.load %arg4[%c2_49, %c0_50, %c0_51] : memref<4x40x256xf32, #tpu.memory_space<vmem>>, vector<1x40x256xf32>
    %110 = vector.shape_cast %109 : vector<1x40x256xf32> to vector<40x256xf32>
    %111 = vector.shape_cast %108 : vector<40x256xf32> to vector<1x40x256xf32>
    tpu.vector_store %arg4[%c2_49, %c0_50, %c0_51], %111 {strides = array<i32>} : memref<4x40x256xf32, #tpu.memory_space<vmem>>, vector<1x40x256xf32>,
    %112 = arith.mulf %55, %57 : vector<40x256xf32>
    %cst_52 = arith.constant 0.000000e+00 : f32
    %113 = vector.broadcast %cst_52 : f32 to vector<40x256xf32>
    %114 = arith.select %27, %112, %113 : vector<40x256xi1>, vector<40x256xf32>
    %c3_53 = arith.constant 3 : index
    %c0_54 = arith.constant 0 : index
    %c0_55 = arith.constant 0 : index
    %115 = vector.load %arg4[%c3_53, %c0_54, %c0_55] : memref<4x40x256xf32, #tpu.memory_space<vmem>>, vector<1x40x256xf32>
    %116 = vector.shape_cast %115 : vector<1x40x256xf32> to vector<40x256xf32>
    %117 = vector.shape_cast %114 : vector<40x256xf32> to vector<1x40x256xf32>
    tpu.vector_store %arg4[%c3_53, %c0_54, %c0_55], %117 {strides = array<i32>} : memref<4x40x256xf32, #tpu.memory_space<vmem>>, vector<1x40x256xf32>,
    return
  }
  func.func @transform_0(%arg0: i32) -> (i32, i32) {
    %c0_i32 = arith.constant 0 : i32
    %c0_i32_0 = arith.constant 0 : i32
    return %arg0, %c0_i32 : i32, i32
  }
  func.func @transform_1(%arg0: i32) -> (i32, i32) {
    %c0_i32 = arith.constant 0 : i32
    %c0_i32_0 = arith.constant 0 : i32
    %c0_i32_1 = arith.constant 0 : i32
    return %c0_i32, %c0_i32_0 : i32, i32
  }
  func.func @transform_2(%arg0: i32) -> (i32, i32, i32) {
    %c0_i32 = arith.constant 0 : i32
    %c0_i32_0 = arith.constant 0 : i32
    %c0_i32_1 = arith.constant 0 : i32
    return %c0_i32, %arg0, %c0_i32_0 : i32, i32, i32
  }
  func.func @transform_3(%arg0: i32) -> (i32, i32, i32) {
    %c0_i32 = arith.constant 0 : i32
    %c0_i32_0 = arith.constant 0 : i32
    %c0_i32_1 = arith.constant 0 : i32
    return %c0_i32, %arg0, %c0_i32_0 : i32, i32, i32
  }
}

</mosaic_0001>

<bundles_post_ra>
// kernel: tpu_custom_call.1
= control target key start
LH: loop header
LB: loop body
LE: loop exit
PB: predicated region body
PF: predicated region fallthrough
CT: control target
= control target key end

     0   :  { %9 = vsyncpa [#allocation3], 0  ;;  %v854_v2 = vmov 2   ;;  %s1870_s0 = inlined_call_operand.vmem [shape: f32[40,4], index: 0, kind: input, shape index: {}]   ;;  %s1871_s1 = inlined_call_operand.vmem [shape: f32[2,256], index: 1, kind: input, shape index: {}]   ;;  %s1872_s2 = inlined_call_operand.hbm [shape: s32[4,40,256], index: 2, kind: output, shape index: {0}]   ;;  %s1873_s3 = inlined_call_operand.hbm [shape: f32[4,40,256], index: 3, kind: output, shape index: {1}]  }
   0x1   :  { %v17_v0 = vld [vmem:[%s1870_s0 + $0x10] sm:$0xff]  ;;  %v15_v1 = vld [vmem:[%s1870_s0] sm:$0xff]  ;;  %799 = vset.pattern.permute.xlu1 %v854_v2  ;;  %798 = vset.pattern.permute.xlu0 %v854_v2 }
   0x2   :  { %35 = vperm.xlu1 %799, %v17_v0   ;;  %25 = vperm.xlu0 %798, %v15_v1  }
   0x3   :  { %10 = vsyncpa [#allocation5], 0  ;;  %v18_v3 = vld [vmem:[%s1870_s0 + $0x18] sm:$0xff]  ;;  %v16_v4 = vld [vmem:[%s1870_s0 + $0x8] sm:$0xff]  ;;  %v855_v6 = vmov 3   ;;  %v856_v7 = vmov 0   ;;  %v49_v13 = vlaneseq }
   0x4   :  { %v19_v5 = vld [vmem:[%s1870_s0 + $0x20] sm:$0xff]  ;;  %v857_v8 = vmov 1   ;;  %s860_s26 = smov [#allocation4]  }
   0x5   :  { %v50_v16 = vshrl.u32 %v49_v13, 7  ;;  %v20_v21 = vld [vmem:[%s1871_s1] ss:$2 sm:$0x3]  ;;  %s733_s27 = sshll.u32 %s860_s26, 4  ;;  %s1822_s27 = int_to_ptr.vmem [resolvable:$true] %s733_s27 }
   0x6   :  { %40 = vperm.xlu1 %799, %v18_v3   ;;  %30 = vperm.xlu0 %798, %v16_v4   ;;  %v748_v38 = vld [vmem:[%s1871_s1 + $0x1] ss:$2 sm:$0x3]  ;;  %s859_s1 = smov [#allocation2]  }
   0x7   :  { %v51_v19 = vsub.s32 0, %v50_v16  ;;  %v55_v20 = vsub.s32 1, %v50_v16  ;;  %s721_s25 = sshll.u32 %s859_s1, 4  ;;  %s1810_s25 = int_to_ptr.vmem [resolvable:$true] %s721_s25 }
   0x8   :  { %s806_s28 = scalar_lea.vmem %s1810_s25, 5120  ;;  %p811_p1 = scmp.lt.s32.totalorder %s1810_s25, %s1810_s25 }
   0x9   :  { %v52_v24 = vrot.slane %v20_v21, %v51_v19  ;;  %v56_v25 = vrot.slane %v20_v21, %v55_v20  ;;  %v123_v43 = vrot.slane %v748_v38, %v51_v19  ;;  %v127_v44 = vrot.slane %v748_v38, %v55_v20  ;;  %p807_p0 = scmp.ne.s32.totalorder %s1810_s25, %s806_s28  ;;  %p812_p2 = scmp.lt.s32.totalorder %s806_s28, %s806_s28 }
   0xa   :  { %800 = vset.pattern.permute.xlu1 %v855_v6  ;;  %45 = vperm.xlu0 %798, %v19_v5  }
   0xb   :  { %100 = vperm.xlu1 %800, %v15_v1   ;;  %p813_p3 = por %p812_p2, %p811_p1 }
   0xd   :  { %p814_p4 = pnand %p813_p3, %p807_p0 }
   0xe   :  { %801 = vset.pattern.permute.xlu0 %v855_v6 }
   0xf   :  { %108 = vperm.xlu1 %800, %v17_v0   ;;  %104 = vperm.xlu0 %801, %v16_v4  }
  0x13   :  { %112 = vperm.xlu1 %800, %v18_v3   ;;  %116 = vperm.xlu0 %801, %v19_v5  }
  0x17   :  { %802 = vset.pattern.permute.xlu1 %v856_v7  ;;  %803 = vset.pattern.permute.xlu0 %v856_v7 }
  0x18   :  { %70 = vperm.xlu1 %802, %v15_v1   ;;  %74 = vperm.xlu0 %803, %v16_v4  }
  0x1c   :  { %78 = vperm.xlu1 %802, %v17_v0   ;;  %86 = vperm.xlu0 %803, %v19_v5  }
  0x20   :  { %82 = vperm.xlu1 %802, %v18_v3   ;;  %805 = vset.pattern.permute.xlu0 %v857_v8 }
  0x21   :  { %145 = vperm.xlu0 %805, %v16_v4  }
  0x24   :  { %804 = vset.pattern.permute.xlu1 %v857_v8 }
  0x25   :  { %141 = vperm.xlu1 %804, %v15_v1   ;;  %157 = vperm.xlu0 %805, %v19_v5  }
  0x29   :  { %149 = vperm.xlu1 %804, %v17_v0  }
  0x2d   :  { %153 = vperm.xlu1 %804, %v18_v3  }
  0x81   :  { %v36_v9 = vpop.permute.xlu1 %35  ;;  %v26_v10 = vpop.permute.xlu0 %25 }
  0x82   :  { %v59_v26 = vmul.f32 %v52_v24, %v26_v10  ;;  %v60_v27 = vmul.f32 %v56_v25, %v26_v10  ;;  %v63_v49 = vmul.f32 %v52_v24, %v36_v9  ;;  %v64_v50 = vmul.f32 %v56_v25, %v36_v9 }
  0x85   :  { %v41_v11 = vpop.permute.xlu1 %40  ;;  %v31_v12 = vpop.permute.xlu0 %30 }
  0x86   :  { %v61_v28 = vmul.f32 %v52_v24, %v31_v12  ;;  %v62_v29 = vmul.f32 %v56_v25, %v31_v12  ;;  %v920_v51 = vmul.f32 %v52_v24, %v41_v11  ;;  %v922_v52 = vmul.f32 %v56_v25, %v41_v11 }
  0x89   :  { %v46_v14 = vpop.permute.xlu0 %45 }
  0x8a   :  { %v101_v15 = vpop.permute.xlu1 %100  ;;  %v67_v53 = vmul.f32 %v52_v24, %v46_v14  ;;  %v68_v54 = vmul.f32 %v56_v25, %v46_v14 }
  0x8b   :  { %v924_v56 = vmul.f32 %v123_v43, %v101_v15  ;;  %v926_v57 = vmul.f32 %v127_v44, %v101_v15 }
  0x8e   :  { %v109_v17 = vpop.permute.xlu1 %108  ;;  %v105_v18 = vpop.permute.xlu0 %104 }
  0x8f   :  { %v928_v58 = vmul.f32 %v123_v43, %v109_v17  ;;  %v930_v59 = vmul.f32 %v127_v44, %v109_v17  ;;  %v934_v62 = vmul.f32 %v123_v43, %v105_v18  ;;  %v936_v63 = vmul.f32 %v127_v44, %v105_v18 }
  0x92   :  { %v113_v22 = vpop.permute.xlu1 %112  ;;  %v117_v23 = vpop.permute.xlu0 %116 }
  0x93   :  { %v948_v7 = vmul.f32 %v123_v43, %v113_v22  ;;  %v950_v8 = vmul.f32 %v127_v44, %v113_v22  ;;  %v952_v9 = vmul.f32 %v123_v43, %v117_v23  ;;  %v954_v10 = vmul.f32 %v127_v44, %v117_v23 }
  0x97   :  { %v71_v30 = vpop.permute.xlu1 %70  ;;  %v75_v31 = vpop.permute.xlu0 %74 }
  0x98   :  { %v901_v32 = vadd.f32 %v71_v30, %v59_v26  ;;  %v903_v33 = vadd.f32 %v71_v30, %v60_v27  ;;  %v905_v34 = vadd.f32 %v75_v31, %v61_v28  ;;  %v907_v35 = vadd.f32 %v75_v31, %v62_v29 }
  0x9a   :  { %v250_v36 = vmax.f32 %v901_v32, 0.0  ;;  %v251_v37 = vmax.f32 %v903_v33, 0.0  ;;  %v252_v39 = vmax.f32 %v905_v34, 0.0  ;;  %v253_v40 = vmax.f32 %v907_v35, 0.0 }
  0x9b   :  { %v79_v55 = vpop.permute.xlu1 %78  ;;  %v87_v2 = vpop.permute.xlu0 %86  ;;  %vm172_vm8 = vcmp.lt.f32.partialorder %v905_v34, -1.0  ;;  %vm182_vm9 = vcmp.gt.f32.partialorder %v905_v34, 16.0  ;;  %vm173_vm10 = vcmp.lt.f32.partialorder %v907_v35, -1.0  ;;  %vm183_vm11 = vcmp.gt.f32.partialorder %v907_v35, 16.0 }
  0x9c   :  { %v749_v41 = vtrunc.f32 %v250_v36  ;;  %v751_v42 = vtrunc.f32 %v251_v37  ;;  %v753_v47 = vtrunc.f32 %v252_v39  ;;  %v755_v48 = vtrunc.f32 %v253_v40  ;;  %vm192_vm13 = vmor %vm172_vm8, %vm182_vm9 }
  0x9d   :  { %v938_v0 = vadd.f32 %v79_v55, %v63_v49  ;;  %v940_v1 = vadd.f32 %v79_v55, %v64_v50  ;;  %v957_v11 = vadd.f32 %v87_v2, %v67_v53  ;;  %v959_v12 = vadd.f32 %v87_v2, %v68_v54  ;;  %vm193_vm15 = vmor %vm173_vm10, %vm183_vm11 }
  0x9e   :  { %v750_v45 = vcvt.f32.s32 %v749_v41  ;;  %v752_v46 = vcvt.f32.s32 %v751_v42  ;;  %v754_v60 = vcvt.f32.s32 %v753_v47  ;;  %v932_v61 = vcvt.f32.s32 %v755_v48 }
  0x9f   :  { %v254_v15 = vmax.f32 %v938_v0, 0.0  ;;  %v255_v16 = vmax.f32 %v940_v1, 0.0  ;;  %v258_v27 = vmax.f32 %v957_v11, 0.0  ;;  %v259_v28 = vmax.f32 %v959_v12, 0.0  ;;  %v83_v55 = vpop.permute.xlu1 %82 }
  0xa0   :  { %vm290_vm0 = vcmp.ge.s32.totalorder %v750_v45, 15  ;;  %vm291_vm1 = vcmp.ge.s32.totalorder %v752_v46, 15  ;;  %v300_v3 = vadd.s32 1, %v750_v45  ;;  %v301_v4 = vadd.s32 1, %v752_v46  ;;  %v146_v50 = vpop.permute.xlu0 %145 }
  0xa1   :  { %v943_v5 = vsel %vm290_vm0, 15, %v750_v45  ;;  %v946_v6 = vsel %vm291_vm1, 15, %v752_v46  ;;  %vm292_vm2 = vcmp.ge.s32.totalorder %v754_v60, 15  ;;  %vm293_vm3 = vcmp.ge.s32.totalorder %v932_v61, 15 }
  0xa2   :  { %v330_v13 = vcvt.s32.f32 %v943_v5  ;;  %v331_v14 = vcvt.s32.f32 %v946_v6  ;;  %v966_v17 = vsel %vm290_vm0, 15, %v300_v3  ;;  %v969_v18 = vsel %vm291_vm1, 15, %v301_v4 }
  0xa3   :  { %v302_v19 = vadd.s32 1, %v754_v60  ;;  %v303_v20 = vadd.s32 1, %v932_v61  ;;  %v757_v23 = vtrunc.f32 %v254_v15  ;;  %v759_v24 = vtrunc.f32 %v255_v16 }
  0xa4   :  { %v975_v25 = vsel %vm292_vm2, 15, %v754_v60  ;;  %v980_v26 = vsel %vm293_vm3, 15, %v932_v61  ;;  %v340_v29 = vsel %vm290_vm0, %v330_v13, %v250_v36  ;;  %v341_v30 = vsel %vm291_vm1, %v331_v14, %v251_v37  ;;  %v142_v22 = vpop.permute.xlu1 %141 }
  0xa5   :  { %v758_v31 = vcvt.f32.s32 %v757_v23  ;;  %v760_v38 = vcvt.f32.s32 %v759_v24  ;;  %v987_v41 = vsel %vm292_vm2, 15, %v302_v19  ;;  %v991_v42 = vsel %vm293_vm3, 15, %v303_v20 }
  0xa6   :  { %v765_v43 = vtrunc.f32 %v258_v27  ;;  %v767_v44 = vtrunc.f32 %v259_v28  ;;  %v332_v45 = vcvt.s32.f32 %v975_v25  ;;  %v333_v36 = vcvt.s32.f32 %v980_v26 }
  0xa7   :  { %vm294_vm4 = vcmp.ge.s32.totalorder %v758_v31, 15  ;;  %vm295_vm5 = vcmp.ge.s32.totalorder %v760_v38, 15  ;;  %v1009_v2 = vsub.f32 %v340_v29, %v330_v13  ;;  %v1011_v3 = vsub.f32 %v341_v30, %v331_v14 }
  0xa8   :  { %v1000_v37 = vsel %vm294_vm4, 15, %v758_v31  ;;  %v1003_v46 = vsel %vm295_vm5, 15, %v760_v38  ;;  %v766_v47 = vcvt.f32.s32 %v765_v43  ;;  %v768_v48 = vcvt.f32.s32 %v767_v44 }
  0xa9   :  { %1888 = vst [vmem:[#allocation8_spill] sm:$0xff] %v1000_v37  ;;  %1889 = vst [vmem:[#allocation9_spill] sm:$0xff] %v1003_v46  ;;  %v334_v53 = vcvt.s32.f32 %v1000_v37  ;;  %v335_v54 = vcvt.s32.f32 %v1003_v46  ;;  %v342_v4 = vsel %vm292_vm2, %v332_v45, %v252_v39  ;;  %v304_v23 = vadd.s32 1, %v758_v31 }
  0xaa   :  { %vm298_vm6 = vcmp.ge.s32.totalorder %v766_v47, 15  ;;  %vm299_vm7 = vcmp.ge.s32.totalorder %v768_v48, 15  ;;  %v343_v13 = vsel %vm293_vm3, %v333_v36, %v253_v40  ;;  %v305_v14 = vadd.s32 1, %v760_v38 }
  0xab   :  { %v1025_v24 = vadd.f32 %v83_v55, %v920_v51  ;;  %v1028_v39 = vadd.f32 %v83_v55, %v922_v52  ;;  %v344_v60 = vsel %vm294_vm4, %v334_v53, %v254_v15  ;;  %v345_v29 = vsel %vm295_vm5, %v335_v54, %v255_v16 }
  0xac   :  { %v1035_v30 = vsel %vm298_vm6, 15, %v766_v47  ;;  %v1038_v40 = vsel %vm299_vm7, 15, %v768_v48  ;;  %v1042_v52 = vsub.f32 %v342_v4, %v332_v45  ;;  %v452_v43 = vmul.u32 16, %v975_v25 }
  0xad   :  { %v1045_v44 = vsub.f32 %v343_v13, %v333_v36  ;;  %v453_v15 = vmul.u32 16, %v980_v26  ;;  %v1049_v16 = vsel %vm294_vm4, 15, %v304_v23  ;;  %v338_v55 = vcvt.s32.f32 %v1035_v30 }
  0xae   :  { %1890 = vst [vmem:[#allocation10_spill] sm:$0xff] %v1049_v16  ;;  %v1053_v49 = vsel %vm295_vm5, 15, %v305_v14  ;;  %v1055_v51 = vsub.f32 %v344_v60, %v334_v53  ;;  %v1057_v61 = vsub.f32 %v345_v29, %v335_v54  ;;  %v339_v45 = vcvt.s32.f32 %v1038_v40 }
  0xaf   :  { %1891 = vst [vmem:[#allocation11_spill] sm:$0xff] %v1053_v49  ;;  %v308_v4 = vadd.s32 1, %v766_v47  ;;  %v309_v36 = vadd.s32 1, %v768_v48  ;;  %v1874_v13 = vmax.f32 %v1025_v24, 0.0  ;;  %v1875_v31 = vmax.f32 %v1028_v39, 0.0 }
  0xb0   :  { %1892 = vst [vmem:[#allocation12_spill] sm:$0xff] %v1055_v51  ;;  %1893 = vst [vmem:[#allocation13_spill] sm:$0xff] %v1057_v61  ;;  %v1065_v38 = vadd.f32 %v146_v50, %v934_v62  ;;  %v1068_v53 = vadd.f32 %v146_v50, %v936_v63  ;;  %v348_v14 = vsel %vm298_vm6, %v338_v55, %v258_v27  ;;  %vm170_vm10 = vcmp.lt.f32.partialorder %v901_v32, -1.0 }
  0xb1   :  { %v761_v60 = vtrunc.f32 %v1874_v13  ;;  %v763_v29 = vtrunc.f32 %v1875_v31  ;;  %v349_v63 = vsel %vm299_vm7, %v339_v45, %v259_v28  ;;  %v1087_v54 = vsel %vm298_vm6, 15, %v308_v4 }
  0xb2   :  { %v1090_v13 = vsel %vm299_vm7, 15, %v309_v36  ;;  %v1092_v31 = vsub.f32 %v348_v14, %v338_v55  ;;  %vm202_vm12 = vcmp.lt.f32.partialorder %v1065_v38, -1.0  ;;  %v262_v21 = vmax.f32 %v1065_v38, 0.0 }
  0xb3   :  { %v263_v62 = vmax.f32 %v1068_v53, 0.0  ;;  %v1101_v28 = vsub.f32 %v349_v63, %v339_v45  ;;  %v1103_v47 = vcvt.f32.s32 %v761_v60  ;;  %v1105_v48 = vcvt.f32.s32 %v763_v29  ;;  %vm212_vm0 = vmor %vm192_vm13, %vm202_vm12 }
  0xb4   :  { %vm203_vm14 = vcmp.lt.f32.partialorder %v1068_v53, -1.0  ;;  %v773_v36 = vtrunc.f32 %v262_v21  ;;  %vm222_vm1 = vcmp.gt.f32.partialorder %v1065_v38, 16.0  ;;  %v1120_v60 = vadd.f32 %v142_v22, %v924_v56 }
  0xb5   :  { %v775_v34 = vtrunc.f32 %v263_v62  ;;  %vm213_vm2 = vmor %vm193_vm15, %vm203_vm14  ;;  %vm223_vm3 = vcmp.gt.f32.partialorder %v1068_v53, 16.0  ;;  %v1124_v63 = vadd.f32 %v142_v22, %v926_v57  ;;  %vm296_vm4 = vcmp.ge.s32.totalorder %v1103_v47, 15 }
  0xb6   :  { %v774_v35 = vcvt.f32.s32 %v773_v36  ;;  %vm297_vm5 = vcmp.ge.s32.totalorder %v1105_v48, 15  ;;  %v1131_v38 = vadd.s32 1, %v1103_v47  ;;  %v1134_v56 = vadd.s32 1, %v1105_v48  ;;  %vm1136_vm6 = vmor %vm212_vm0, %vm222_vm1 }
  0xb7   :  { %v776_v29 = vcvt.f32.s32 %v775_v34  ;;  %vm1140_vm9 = vmor %vm213_vm2, %vm223_vm3  ;;  %v1149_v27 = vsel %vm296_vm4, 15, %v1103_v47  ;;  %v1154_v14 = vsel %vm297_vm5, 15, %v1105_v48  ;;  %vm180_vm11 = vcmp.gt.f32.partialorder %v901_v32, 16.0 }
  0xb8   :  { %vm352_vm7 = vcmp.ge.s32.totalorder %v774_v35, 15  ;;  %v362_v22 = vadd.s32 1, %v774_v35  ;;  %vm858_vm12 = vmmov 1   ;;  %vm171_vm14 = vcmp.lt.f32.partialorder %v903_v33, -1.0  ;;  %vm1246_vm3 = vmor %vm170_vm10, %vm180_vm11 }
  0xb9   :  { %vm353_vm8 = vcmp.ge.s32.totalorder %v776_v29, 15  ;;  %v363_v36 = vadd.s32 1, %v776_v29  ;;  %v382_v34 = vsel %vm352_vm7, 15, %v774_v35  ;;  %vm1161_vm13 = vmxor %vm1136_vm6, %vm858_vm12  ;;  %vm181_vm15 = vcmp.gt.f32.partialorder %v903_v33, 16.0 }
  0xba   :  { %v383_v50 = vsel %vm353_vm8, 15, %v776_v29  ;;  %v392_v45 = vcvt.s32.f32 %v382_v34  ;;  %v372_v23 = vsel %vm352_vm7, 15, %v362_v22  ;;  %v462_v19 = vadd.s32 %v452_v43, %v382_v34  ;;  %vm1176_vm0 = vmxor %vm1140_vm9, %vm858_vm12 }
  0xbb   :  { %v393_v4 = vcvt.s32.f32 %v383_v50  ;;  %v373_v20 = vsel %vm353_vm8, 15, %v363_v36  ;;  %v463_v61 = vadd.s32 %v453_v15, %v383_v50  ;;  %v492_v51 = vadd.s32 %v452_v43, %v372_v23  ;;  %vm191_vm6 = vmor %vm171_vm14, %vm181_vm15 }
  0xbc   :  { %v402_v22 = vsel %vm352_vm7, %v392_v45, %v262_v21  ;;  %v493_v49 = vadd.s32 %v453_v15, %v373_v20  ;;  %v472_v37 = vsel %vm1161_vm13, %v462_v19, 0  ;;  %v1902_v43 = vmul.u32 16, %v987_v41 }
  0xbd   :  { %v403_v36 = vsel %vm353_vm8, %v393_v4, %v263_v62  ;;  %v422_v16 = vsub.f32 %v402_v22, %v392_v45  ;;  %v473_v57 = vsel %vm1176_vm0, %v463_v61, 0  ;;  %482 = vst [vmem:[#allocation2 + $0x10] sm:$0xff] %v472_v37  ;;  %v502_v21 = vsel %vm1161_vm13, %v492_v51, 0 }
  0xbe   :  { %v423_v46 = vsub.f32 %v403_v36, %v393_v4  ;;  %483 = vst [vmem:[#allocation2 + $0x18] sm:$0xff] %v473_v57  ;;  %v503_v25 = vsel %vm1176_vm0, %v493_v49, 0  ;;  %v533_v26 = vadd.s32 %v1902_v43, %v382_v34  ;;  %v1903_v15 = vmul.u32 16, %v991_v42  ;;  %513 = vst [vmem:[#allocation2 + $0x60] sm:$0xff] %v502_v21 }
  0xbf   :  { %v442_v4 = vsub.f32 1.0, %v422_v16  ;;  %514 = vst [vmem:[#allocation2 + $0x68] sm:$0xff] %v503_v25  ;;  %v1904_v19 = vmov %v1902_v43  ;;  %v1906_v29 = vsub.f32 1.0, %v1042_v52  ;;  %vm200_vm1 = vcmp.lt.f32.partialorder %v1120_v60, -1.0 }
  0xc0   :  { %v534_v62 = vadd.s32 %v1903_v15, %v383_v50  ;;  %v443_v45 = vsub.f32 1.0, %v423_v46  ;;  %v564_v37 = vadd.s32 %v1904_v19, %v372_v23  ;;  %v1905_v61 = vmov %v1903_v15  ;;  %vm1278_vm7 = vmor %vm1246_vm3, %vm200_vm1 }
  0xc1   :  { %v565_v35 = vadd.s32 %v1905_v61, %v373_v20  ;;  %v543_v51 = vsel %vm1161_vm13, %v533_v26, 0  ;;  %v625_v34 = vmul.f32 %v1906_v29, %v422_v16  ;;  %v1907_v50 = vsub.f32 1.0, %v1045_v44  ;;  %v158_v61 = vpop.permute.xlu0 %157 }
  0xc2   :  { %v544_v49 = vsel %vm1176_vm0, %v534_v62, 0  ;;  %554 = vst [vmem:[#allocation2 + $0xb0] sm:$0xff] %v543_v51  ;;  %v574_v41 = vsel %vm1161_vm13, %v564_v37, 0  ;;  %v1908_v20 = vmov %v1906_v29  ;;  %v656_v43 = vmul.f32 %v442_v4, %v1042_v52 }
  0xc3   :  { %v626_v22 = vmul.f32 %v1907_v50, %v423_v46  ;;  %555 = vst [vmem:[#allocation2 + $0xb8] sm:$0xff] %v544_v49  ;;  %v575_v42 = vsel %vm1176_vm0, %v565_v35, 0  ;;  %v595_v23 = vmul.f32 %v442_v4, %v1908_v20  ;;  %v1909_v36 = vmov %v1907_v50  ;;  %585 = vst [vmem:[#allocation2 + $0x100] sm:$0xff] %v574_v41  ;;  %v150_v50 = vpop.permute.xlu1 %149 }
  0xc4   :  { %v596_v57 = vmul.f32 %v443_v45, %v1909_v36  ;;  %586 = vst [vmem:[#allocation2 + $0x108] sm:$0xff] %v575_v42  ;;  %v635_v21 = vsel %vm1161_vm13, %v625_v34, 0.0  ;;  %v657_v26 = vmul.f32 %v443_v45, %v1045_v44  ;;  %v687_v19 = vmul.f32 %v422_v16, %v1042_v52 }
  0xc5   :  { %v636_v25 = vsel %vm1176_vm0, %v626_v22, 0.0  ;;  %v605_v15 = vsel %vm1161_vm13, %v595_v23, 0.0  ;;  %646 = vst [vmem:[#allocation4 + $0x60] sm:$0xff] %v635_v21  ;;  %v688_v37 = vmul.f32 %v423_v46, %v1045_v44  ;;  %v666_v4 = vsel %vm1161_vm13, %v656_v43, 0.0 }
  0xc6   :  { %v606_v62 = vsel %vm1176_vm0, %v596_v57, 0.0  ;;  %647 = vst [vmem:[#allocation4 + $0x68] sm:$0xff] %v636_v25  ;;  %615 = vst [vmem:[#allocation4 + $0x10] sm:$0xff] %v605_v15  ;;  %v667_v45 = vsel %vm1176_vm0, %v657_v26, 0.0  ;;  %vm201_vm2 = vcmp.lt.f32.partialorder %v1124_v63, -1.0  ;;  %v697_v52 = vsel %vm1161_vm13, %v687_v19, 0.0 }
  0xc7   :  { %616 = vst [vmem:[#allocation4 + $0x18] sm:$0xff] %v606_v62  ;;  %677 = vst [vmem:[#allocation4 + $0xb0] sm:$0xff] %v666_v4  ;;  %v698_v46 = vsel %vm1176_vm0, %v688_v37, 0.0  ;;  %v260_v44 = vmax.f32 %v1120_v60, 0.0  ;;  %v261_v16 = vmax.f32 %v1124_v63, 0.0  ;;  %v336_v51 = vcvt.s32.f32 %v1149_v27 }
  0xc8   :  { %678 = vst [vmem:[#allocation4 + $0xb8] sm:$0xff] %v667_v45  ;;  %v337_v55 = vcvt.s32.f32 %v1154_v14  ;;  %708 = vst [vmem:[#allocation4 + $0x100] sm:$0xff] %v697_v52  ;;  %v1253_v53 = vadd.f32 %v158_v61, %v952_v9  ;;  %v1256_v49 = vadd.f32 %v158_v61, %v954_v10  ;;  %v1265_v32 = vsel %vm296_vm4, 15, %v1131_v38 }
  0xc9   :  { %709 = vst [vmem:[#allocation4 + $0x108] sm:$0xff] %v698_v46  ;;  %v1270_v29 = vsel %vm297_vm5, 15, %v1134_v56  ;;  %v769_v9 = vtrunc.f32 %v260_v44  ;;  %v771_v34 = vtrunc.f32 %v261_v16  ;;  %v456_v10 = vmul.u32 16, %v1149_v27  ;;  %vm1288_vm13 = vmor %vm191_vm6, %vm201_vm2 }
  0xca   :  { %v457_v22 = vmul.u32 16, %v1154_v14  ;;  %vm220_vm8 = vcmp.gt.f32.partialorder %v1120_v60, 16.0  ;;  %vm221_vm9 = vcmp.gt.f32.partialorder %v1124_v63, 16.0  ;;  %vm178_vm10 = vcmp.lt.f32.partialorder %v957_v11, -1.0 }
  0xcb   :  { %vm188_vm11 = vcmp.gt.f32.partialorder %v957_v11, 16.0  ;;  %v770_v56 = vcvt.f32.s32 %v769_v9  ;;  %v772_v41 = vcvt.f32.s32 %v771_v34  ;;  %v268_v42 = vmax.f32 %v1253_v53, 0.0  ;;  %vm1331_vm2 = vmor %vm1288_vm13, %vm221_vm9 }
  0xcc   :  { %v269_v20 = vmax.f32 %v1256_v49, 0.0  ;;  %vm179_vm14 = vcmp.lt.f32.partialorder %v959_v12, -1.0  ;;  %vm189_vm15 = vcmp.gt.f32.partialorder %v959_v12, 16.0  ;;  %v1916_v23 = vmax.f32 %v1025_v24, 0.0  ;;  %vm1412_vm13 = vmor %vm178_vm10, %vm188_vm11 }
  0xcd   :  { %v1917_v57 = vmax.f32 %v1028_v39, 0.0  ;;  %v1313_v25 = vadd.f32 %v150_v50, %v928_v58  ;;  %v1316_v43 = vadd.f32 %v150_v50, %v930_v59  ;;  %vm350_vm0 = vcmp.ge.s32.totalorder %v770_v56, 15  ;;  %vm1426_vm10 = vmor %vm179_vm14, %vm189_vm15 }
  0xce   :  { %v1302_v36 = vsel %vm296_vm4, %v336_v51, %v1916_v23  ;;  %vm1322_vm4 = vmor %vm1278_vm7, %vm220_vm8  ;;  %vm351_vm1 = vcmp.ge.s32.totalorder %v772_v41, 15  ;;  %v360_v26 = vadd.s32 1, %v770_v56  ;;  %v361_v48 = vadd.s32 1, %v772_v41 }
  0xcf   :  { %v1310_v21 = vsel %vm297_vm5, %v337_v55, %v1917_v57  ;;  %vm208_vm5 = vcmp.lt.f32.partialorder %v1253_v53, -1.0  ;;  %v380_v59 = vsel %vm350_vm0, 15, %v770_v56  ;;  %v381_v60 = vsel %vm351_vm1, 15, %v772_v41  ;;  %vm1351_vm6 = vmxor %vm1322_vm4, %vm858_vm12 }
  0xd0   :  { %vm209_vm3 = vcmp.lt.f32.partialorder %v1256_v49, -1.0  ;;  %v1340_v15 = vtrunc.f32 %v268_v42  ;;  %v1344_v62 = vtrunc.f32 %v269_v20  ;;  %v370_v63 = vsel %vm350_vm0, 15, %v360_v26  ;;  %vm1367_vm8 = vmxor %vm1331_vm2, %vm858_vm12 }
  0xd1   :  { %v371_v19 = vsel %vm351_vm1, 15, %v361_v48  ;;  %v390_v37 = vcvt.s32.f32 %v380_v59  ;;  %v391_v61 = vcvt.s32.f32 %v381_v60  ;;  %v1924_v45 = vmul.u32 16, %v943_v5  ;;  %vm1442_vm11 = vmor %vm1412_vm13, %vm208_vm5 }
  0xd2   :  { %v1925_v46 = vmul.u32 16, %v946_v6  ;;  %vm228_vm7 = vcmp.gt.f32.partialorder %v1253_v53, 16.0  ;;  %v1930_v47 = vmul.u32 16, %v966_v17  ;;  %vm229_vm9 = vcmp.gt.f32.partialorder %v1256_v49, 16.0  ;;  %vm1456_vm4 = vmor %vm1426_vm10, %vm209_vm3 }
  0xd3   :  { %v460_v52 = vadd.s32 %v1924_v45, %v380_v59  ;;  %v1926_v9 = vmov %v1924_v45  ;;  %v400_v23 = vsel %vm350_vm0, %v390_v37, %v260_v44  ;;  %v401_v57 = vsel %vm351_vm1, %v391_v61, %v261_v16  ;;  %vm1476_vm5 = vmor %vm1442_vm11, %vm228_vm7 }
  0xd4   :  { %v461_v35 = vadd.s32 %v1925_v46, %v381_v60  ;;  %v490_v34 = vadd.s32 %v1926_v9, %v370_v63  ;;  %v1927_v50 = vmov %v1925_v46  ;;  %v531_v5 = vadd.s32 %v1930_v47, %v380_v59 }
  0xd5   :  { %v491_v33 = vadd.s32 %v1927_v50, %v371_v19  ;;  %v1931_v26 = vmul.u32 16, %v969_v18  ;;  %v420_v48 = vsub.f32 %v400_v23, %v390_v37  ;;  %v421_v45 = vsub.f32 %v401_v57, %v391_v61 }
  0xd6   :  { %v470_v58 = vsel %vm1351_vm6, %v460_v52, 0  ;;  %v471_v46 = vsel %vm1367_vm8, %v461_v35, 0  ;;  %v500_v44 = vsel %vm1351_vm6, %v490_v34, 0  ;;  %v541_v56 = vsel %vm1351_vm6, %v531_v5, 0 }
  0xd7   :  { %v532_v6 = vadd.s32 %v1931_v26, %v381_v60  ;;  %480 = vst [vmem:[#allocation2] sm:$0xff] %v470_v58  ;;  %481 = vst [vmem:[#allocation2 + $0x8] sm:$0xff] %v471_v46  ;;  %v501_v16 = vsel %vm1367_vm8, %v491_v33, 0  ;;  %v440_v59 = vsub.f32 1.0, %v420_v48  ;;  %v441_v60 = vsub.f32 1.0, %v421_v45  ;;  %v154_v46 = vpop.permute.xlu1 %153 }
  0xd8   :  { %511 = vst [vmem:[#allocation2 + $0x50] sm:$0xff] %v500_v44  ;;  %512 = vst [vmem:[#allocation2 + $0x58] sm:$0xff] %v501_v16  ;;  %v1932_v37 = vmov %v1930_v47  ;;  %v1933_v52 = vmov %v1931_v26  ;;  %v1934_v9 = vsub.f32 1.0, %v1009_v2  ;;  %v1935_v50 = vsub.f32 1.0, %v1011_v3 }
  0xd9   :  { %v542_v41 = vsel %vm1367_vm8, %v532_v6, 0  ;;  %552 = vst [vmem:[#allocation2 + $0xa0] sm:$0xff] %v541_v56  ;;  %v562_v61 = vadd.s32 %v1932_v37, %v370_v63  ;;  %v563_v35 = vadd.s32 %v1933_v52, %v371_v19  ;;  %v685_v23 = vmul.f32 %v420_v48, %v1009_v2 }
  0xda   :  { %553 = vst [vmem:[#allocation2 + $0xa8] sm:$0xff] %v542_v41  ;;  %v623_v34 = vmul.f32 %v1934_v9, %v420_v48  ;;  %v624_v33 = vmul.f32 %v1935_v50, %v421_v45  ;;  %v686_v57 = vmul.f32 %v421_v45, %v1011_v3  ;;  %v1936_v63 = vmov %v1934_v9 }
  0xdb   :  { %v572_v47 = vsel %vm1351_vm6, %v562_v61, 0  ;;  %v573_v17 = vsel %vm1367_vm8, %v563_v35, 0  ;;  %v593_v18 = vmul.f32 %v440_v59, %v1936_v63  ;;  %v1937_v19 = vmov %v1935_v50 }
  0xdc   :  { %v594_v5 = vmul.f32 %v441_v60, %v1937_v19  ;;  %583 = vst [vmem:[#allocation2 + $0xf0] sm:$0xff] %v572_v47  ;;  %584 = vst [vmem:[#allocation2 + $0xf8] sm:$0xff] %v573_v17  ;;  %v633_v6 = vsel %vm1351_vm6, %v623_v34, 0.0  ;;  %v634_v48 = vsel %vm1367_vm8, %v624_v33, 0.0  ;;  %v654_v45 = vmul.f32 %v440_v59, %v1009_v2 }
  0xdd   :  { %v655_v58 = vmul.f32 %v441_v60, %v1011_v3  ;;  %v603_v44 = vsel %vm1351_vm6, %v593_v18, 0.0  ;;  %644 = vst [vmem:[#allocation4 + $0x50] sm:$0xff] %v633_v6  ;;  %645 = vst [vmem:[#allocation4 + $0x58] sm:$0xff] %v634_v48  ;;  %v695_v2 = vsel %vm1351_vm6, %v685_v23, 0.0  ;;  %v696_v3 = vsel %vm1367_vm8, %v686_v57, 0.0 }
  0xde   :  { %v604_v16 = vsel %vm1367_vm8, %v594_v5, 0.0  ;;  %vm174_vm14 = vcmp.lt.f32.partialorder %v938_v0, -1.0  ;;  %vm184_vm15 = vcmp.gt.f32.partialorder %v938_v0, 16.0  ;;  %613 = vst [vmem:[#allocation4] sm:$0xff] %v603_v44  ;;  %v664_v56 = vsel %vm1351_vm6, %v654_v45, 0.0  ;;  %706 = vst [vmem:[#allocation4 + $0xf0] sm:$0xff] %v695_v2 }
  0xdf   :  { %614 = vst [vmem:[#allocation4 + $0x8] sm:$0xff] %v604_v16  ;;  %v665_v41 = vsel %vm1367_vm8, %v655_v58, 0.0  ;;  %707 = vst [vmem:[#allocation4 + $0xf8] sm:$0xff] %v696_v3  ;;  %v786_v60 = vcvt.f32.s32 %v1340_v15  ;;  %v788_v37 = vcvt.f32.s32 %v1344_v62  ;;  %vm175_vm0 = vcmp.lt.f32.partialorder %v940_v1, -1.0 }
  0xe0   :  { %vm185_vm1 = vcmp.gt.f32.partialorder %v940_v1, 16.0  ;;  %675 = vst [vmem:[#allocation4 + $0xa0] sm:$0xff] %v664_v56  ;;  %676 = vst [vmem:[#allocation4 + $0xa8] sm:$0xff] %v665_v41  ;;  %v264_v4 = vmax.f32 %v1313_v25, 0.0  ;;  %v265_v38 = vmax.f32 %v1316_v43, 0.0  ;;  %v1467_v61 = vadd.f32 %v154_v46, %v948_v7 }
  0xe1   :  { %v1470_v52 = vadd.f32 %v154_v46, %v950_v8  ;;  %vm358_vm2 = vcmp.ge.s32.totalorder %v786_v60, 15  ;;  %vm359_vm3 = vcmp.ge.s32.totalorder %v788_v37, 15  ;;  %v368_v62 = vadd.s32 1, %v786_v60  ;;  %vm1485_vm8 = vmor %vm1456_vm4, %vm229_vm9 }
  0xe2   :  { %v369_v35 = vadd.s32 1, %v788_v37  ;;  %vm204_vm6 = vcmp.lt.f32.partialorder %v1313_v25, -1.0  ;;  %v388_v8 = vsel %vm358_vm2, 15, %v786_v60  ;;  %v389_v9 = vsel %vm359_vm3, 15, %v788_v37  ;;  %vm1505_vm9 = vmxor %vm1476_vm5, %vm858_vm12 }
  0xe3   :  { %vm205_vm7 = vcmp.lt.f32.partialorder %v1316_v43, -1.0  ;;  %v1494_v34 = vtrunc.f32 %v264_v4  ;;  %v1498_v50 = vtrunc.f32 %v265_v38  ;;  %v378_v33 = vsel %vm358_vm2, 15, %v368_v62  ;;  %vm1521_vm10 = vmxor %vm1485_vm8, %vm858_vm12 }
  0xe4   :  { %v379_v23 = vsel %vm359_vm3, 15, %v369_v35  ;;  %v398_v57 = vcvt.s32.f32 %v388_v8  ;;  %v399_v47 = vcvt.s32.f32 %v389_v9  ;;  %v1952_v63 = vmul.u32 16, %v1035_v30  ;;  %vm1562_vm4 = vmor %vm174_vm14, %vm184_vm15 }
  0xe5   :  { %v1953_v19 = vmul.u32 16, %v1038_v40  ;;  %vm224_vm13 = vcmp.gt.f32.partialorder %v1313_v25, 16.0  ;;  %v1958_v40 = vmul.u32 16, %v1087_v54  ;;  %vm225_vm11 = vcmp.gt.f32.partialorder %v1316_v43, 16.0  ;;  %vm1578_vm14 = vmor %vm175_vm0, %vm185_vm1 }
  0xe6   :  { %v468_v18 = vadd.s32 %v1952_v63, %v388_v8  ;;  %v1954_v26 = vmov %v1952_v63  ;;  %v408_v11 = vsel %vm358_vm2, %v398_v57, %v268_v42  ;;  %v409_v30 = vsel %vm359_vm3, %v399_v47, %v269_v20  ;;  %vm1600_vm15 = vmor %vm1562_vm4, %vm204_vm6 }
  0xe7   :  { %v469_v5 = vadd.s32 %v1953_v19, %v389_v9  ;;  %v498_v6 = vadd.s32 %v1954_v26, %v378_v33  ;;  %v1955_v48 = vmov %v1953_v19  ;;  %v539_v46 = vadd.s32 %v1958_v40, %v388_v8  ;;  %vm1614_vm5 = vmor %vm1578_vm14, %vm205_vm7 }
  0xe8   :  { %v499_v45 = vadd.s32 %v1955_v48, %v379_v23  ;;  %v1959_v44 = vmul.u32 16, %v1090_v13  ;;  %v428_v2 = vsub.f32 %v408_v11, %v398_v57  ;;  %v429_v3 = vsub.f32 %v409_v30, %v399_v47  ;;  %vm1638_vm6 = vmor %vm1600_vm15, %vm224_vm13 }
  0xe9   :  { %v478_v12 = vsel %vm1505_vm9, %v468_v18, 0  ;;  %v479_v53 = vsel %vm1521_vm10, %v469_v5, 0  ;;  %v508_v49 = vsel %vm1505_vm9, %v498_v6, 0  ;;  %v549_v20 = vsel %vm1505_vm9, %v539_v46, 0 }
  0xea   :  { %v540_v16 = vadd.s32 %v1959_v44, %v389_v9  ;;  %488 = vst [vmem:[#allocation2 + $0x40] sm:$0xff] %v478_v12  ;;  %489 = vst [vmem:[#allocation2 + $0x48] sm:$0xff] %v479_v53  ;;  %v509_v42 = vsel %vm1521_vm10, %v499_v45, 0  ;;  %v448_v41 = vsub.f32 1.0, %v428_v2  ;;  %v449_v59 = vsub.f32 1.0, %v429_v3 }
  0xeb   :  { %519 = vst [vmem:[#allocation2 + $0x90] sm:$0xff] %v508_v49  ;;  %520 = vst [vmem:[#allocation2 + $0x98] sm:$0xff] %v509_v42  ;;  %v1960_v60 = vmov %v1958_v40  ;;  %v1961_v15 = vmov %v1959_v44  ;;  %v1962_v35 = vsub.f32 1.0, %v1092_v31  ;;  %v1963_v8 = vsub.f32 1.0, %v1101_v28 }
  0xec   :  { %v550_v56 = vsel %vm1521_vm10, %v540_v16, 0  ;;  %560 = vst [vmem:[#allocation2 + $0xe0] sm:$0xff] %v549_v20  ;;  %v570_v37 = vadd.s32 %v1960_v60, %v378_v33  ;;  %v571_v62 = vadd.s32 %v1961_v15, %v379_v23  ;;  %v693_v57 = vmul.f32 %v428_v2, %v1092_v31  ;;  %v1982_v15 = vld [vmem:[#allocation9_spill] sm:$0xff] }
  0xed   :  { %561 = vst [vmem:[#allocation2 + $0xe8] sm:$0xff] %v550_v56  ;;  %v631_v7 = vmul.f32 %v1962_v35, %v428_v2  ;;  %v632_v9 = vmul.f32 %v1963_v8, %v429_v3  ;;  %v694_v47 = vmul.f32 %v429_v3, %v1101_v28  ;;  %v1966_v23 = vmov %v1962_v35 }
  0xee   :  { %v580_v13 = vsel %vm1505_vm9, %v570_v37, 0  ;;  %v581_v33 = vsel %vm1521_vm10, %v571_v62, 0  ;;  %v601_v63 = vmul.f32 %v448_v41, %v1966_v23  ;;  %v1967_v18 = vmov %v1963_v8 }
  0xef   :  { %v602_v19 = vmul.f32 %v449_v59, %v1967_v18  ;;  %591 = vst [vmem:[#allocation2 + $0x130] sm:$0xff] %v580_v13  ;;  %592 = vst [vmem:[#allocation2 + $0x138] sm:$0xff] %v581_v33  ;;  %v641_v5 = vsel %vm1505_vm9, %v631_v7, 0.0  ;;  %v642_v26 = vsel %vm1521_vm10, %v632_v9, 0.0  ;;  %v662_v6 = vmul.f32 %v448_v41, %v1092_v31  ;;  %v1988_v33 = vld [vmem:[#allocation10_spill] sm:$0xff]  ;;  %v1990_v18 = vld [vmem:[#allocation11_spill] sm:$0xff] }
  0xf0   :  { %v663_v48 = vmul.f32 %v449_v59, %v1101_v28  ;;  %v611_v45 = vsel %vm1505_vm9, %v601_v63, 0.0  ;;  %652 = vst [vmem:[#allocation4 + $0x90] sm:$0xff] %v641_v5  ;;  %653 = vst [vmem:[#allocation4 + $0x98] sm:$0xff] %v642_v26  ;;  %v703_v11 = vsel %vm1505_vm9, %v693_v57, 0.0  ;;  %v704_v30 = vsel %vm1521_vm10, %v694_v47, 0.0  ;;  %v1980_v59 = vld [vmem:[#allocation8_spill] sm:$0xff] }
  0xf1   :  { %v612_v1 = vsel %vm1521_vm10, %v602_v19, 0.0  ;;  %vm176_vm0 = vcmp.lt.f32.partialorder %v1025_v24, -1.0  ;;  %vm186_vm1 = vcmp.gt.f32.partialorder %v1025_v24, 16.0  ;;  %621 = vst [vmem:[#allocation4 + $0x40] sm:$0xff] %v611_v45  ;;  %v672_v28 = vsel %vm1505_vm9, %v662_v6, 0.0  ;;  %714 = vst [vmem:[#allocation4 + $0x130] sm:$0xff] %v703_v11 }
  0xf2   :  { %622 = vst [vmem:[#allocation4 + $0x48] sm:$0xff] %v612_v1  ;;  %v673_v40 = vsel %vm1521_vm10, %v663_v48, 0.0  ;;  %715 = vst [vmem:[#allocation4 + $0x138] sm:$0xff] %v704_v30  ;;  %v778_v44 = vcvt.f32.s32 %v1494_v34  ;;  %v780_v16 = vcvt.f32.s32 %v1498_v50  ;;  %vm177_vm2 = vcmp.lt.f32.partialorder %v1028_v39, -1.0 }
  0xf3   :  { %vm187_vm3 = vcmp.gt.f32.partialorder %v1028_v39, 16.0  ;;  %v1625_v17 = vsub.f32 %v1302_v36, %v336_v51  ;;  %v1630_v58 = vsub.f32 %v1310_v21, %v337_v55  ;;  %683 = vst [vmem:[#allocation4 + $0xe0] sm:$0xff] %v672_v28  ;;  %684 = vst [vmem:[#allocation4 + $0xe8] sm:$0xff] %v673_v40  ;;  %v266_v34 = vmax.f32 %v1467_v61, 0.0  ;;  %v1994_v40 = vld [vmem:[#allocation12_spill] sm:$0xff] }
  0xf4   :  { %v267_v50 = vmax.f32 %v1470_v52, 0.0  ;;  %vm354_vm8 = vcmp.ge.s32.totalorder %v778_v44, 15  ;;  %vm355_vm7 = vcmp.ge.s32.totalorder %v780_v16, 15  ;;  %v364_v51 = vadd.s32 1, %v778_v44  ;;  %vm1647_vm10 = vmor %vm1614_vm5, %vm225_vm11 }
  0xf5   :  { %v365_v36 = vadd.s32 1, %v780_v16  ;;  %vm206_vm9 = vcmp.lt.f32.partialorder %v1467_v61, -1.0  ;;  %v384_v21 = vsel %vm354_vm8, 15, %v778_v44  ;;  %v385_v3 = vsel %vm355_vm7, 15, %v780_v16  ;;  %vm1667_vm11 = vmxor %vm1638_vm6, %vm858_vm12  ;;  %v1996_v16 = vld [vmem:[#allocation13_spill] sm:$0xff] }
  0xf6   :  { %vm207_vm13 = vcmp.lt.f32.partialorder %v1470_v52, -1.0  ;;  %v1656_v12 = vtrunc.f32 %v266_v34  ;;  %v1660_v53 = vtrunc.f32 %v267_v50  ;;  %v374_v49 = vsel %vm354_vm8, 15, %v364_v51  ;;  %vm1683_vm14 = vmxor %vm1647_vm10, %vm858_vm12 }
  0xf7   :  { %v375_v42 = vsel %vm355_vm7, 15, %v365_v36  ;;  %v394_v20 = vcvt.s32.f32 %v384_v21  ;;  %v395_v56 = vcvt.s32.f32 %v385_v3  ;;  %v1981_v60 = vmul.u32 16, %v1980_v59  ;;  %vm196_vm5 = vmor %vm176_vm0, %vm186_vm1 }
  0xf8   :  { %v1983_v62 = vmul.u32 16, %v1982_v15  ;;  %vm226_vm4 = vcmp.gt.f32.partialorder %v1467_v61, 16.0  ;;  %v1989_v23 = vmul.u32 16, %v1988_v33  ;;  %vm227_vm15 = vcmp.gt.f32.partialorder %v1470_v52, 16.0  ;;  %vm197_vm6 = vmor %vm177_vm2, %vm187_vm3 }
  0xf9   :  { %v464_v37 = vadd.s32 %v1981_v60, %v384_v21  ;;  %v1984_v7 = vmov %v1981_v60  ;;  %v404_v54 = vsel %vm354_vm8, %v394_v20, %v264_v4  ;;  %v405_v13 = vsel %vm355_vm7, %v395_v56, %v265_v38  ;;  %vm216_vm0 = vmor %vm196_vm5, %vm206_vm9 }
  0xfa   :  { %v465_v35 = vadd.s32 %v1983_v62, %v385_v3  ;;  %v494_v8 = vadd.s32 %v1984_v7, %v374_v49  ;;  %v1985_v9 = vmov %v1983_v62  ;;  %v535_v63 = vadd.s32 %v1989_v23, %v384_v21  ;;  %vm217_vm1 = vmor %vm197_vm6, %vm207_vm13 }
  0xfb   :  { %v495_v57 = vadd.s32 %v1985_v9, %v375_v42  ;;  %v1991_v19 = vmul.u32 16, %v1990_v18  ;;  %v424_v5 = vsub.f32 %v404_v54, %v394_v20  ;;  %v425_v26 = vsub.f32 %v405_v13, %v395_v56  ;;  %vm236_vm2 = vmor %vm216_vm0, %vm226_vm4 }
  0xfc   :  { %v474_v6 = vsel %vm1667_vm11, %v464_v37, 0  ;;  %v475_v25 = vsel %vm1683_vm14, %v465_v35, 0  ;;  %v504_v43 = vsel %vm1667_vm11, %v494_v8, 0  ;;  %v545_v38 = vsel %vm1667_vm11, %v535_v63, 0  ;;  %vm237_vm7 = vmor %vm217_vm1, %vm227_vm15 }
  0xfd   :  { %v536_v0 = vadd.s32 %v1991_v19, %v385_v3  ;;  %484 = vst [vmem:[#allocation2 + $0x20] sm:$0xff] %v474_v6  ;;  %485 = vst [vmem:[#allocation2 + $0x28] sm:$0xff] %v475_v25  ;;  %v505_v4 = vsel %vm1683_vm14, %v495_v57, 0  ;;  %v444_v45 = vsub.f32 1.0, %v424_v5  ;;  %v445_v1 = vsub.f32 1.0, %v425_v26 }
  0xfe   :  { %515 = vst [vmem:[#allocation2 + $0x70] sm:$0xff] %v504_v43  ;;  %516 = vst [vmem:[#allocation2 + $0x78] sm:$0xff] %v505_v4  ;;  %v1992_v11 = vmov %v1989_v23  ;;  %v1993_v31 = vmov %v1991_v19  ;;  %v1995_v46 = vsub.f32 1.0, %v1994_v40  ;;  %v1997_v2 = vsub.f32 1.0, %v1996_v16 }
  0xff   :  { %v546_v48 = vsel %vm1683_vm14, %v536_v0, 0  ;;  %556 = vst [vmem:[#allocation2 + $0xc0] sm:$0xff] %v545_v38  ;;  %v566_v30 = vadd.s32 %v1992_v11, %v374_v49  ;;  %v567_v28 = vadd.s32 %v1993_v31, %v375_v42  ;;  %v689_v36 = vmul.f32 %v424_v5, %v1994_v40  ;;  %vm1773_vm9 = vmxor %vm236_vm2, %vm858_vm12 }
 0x100   :  { %557 = vst [vmem:[#allocation2 + $0xc8] sm:$0xff] %v546_v48  ;;  %v627_v44 = vmul.f32 %v1995_v46, %v424_v5  ;;  %v628_v51 = vmul.f32 %v1997_v2, %v425_v26  ;;  %v690_v55 = vmul.f32 %v425_v26, %v1996_v16  ;;  %v1998_v49 = vmov %v1995_v46  ;;  %vm1786_vm10 = vmxor %vm237_vm7, %vm858_vm12 }
 0x101   :  { %v576_v21 = vsel %vm1667_vm11, %v566_v30, 0  ;;  %v577_v3 = vsel %vm1683_vm14, %v567_v28, 0  ;;  %v597_v20 = vmul.f32 %v444_v45, %v1998_v49  ;;  %v1999_v42 = vmov %v1997_v2 }
 0x102   :  { %v598_v56 = vmul.f32 %v445_v1, %v1999_v42  ;;  %587 = vst [vmem:[#allocation2 + $0x110] sm:$0xff] %v576_v21  ;;  %588 = vst [vmem:[#allocation2 + $0x118] sm:$0xff] %v577_v3  ;;  %v637_v59 = vsel %vm1667_vm11, %v627_v44, 0.0  ;;  %v638_v60 = vsel %vm1683_vm14, %v628_v51, 0.0  ;;  %v658_v37 = vmul.f32 %v444_v45, %v1994_v40 }
 0x103   :  { %v659_v15 = vmul.f32 %v445_v1, %v1996_v16  ;;  %v607_v24 = vsel %vm1667_vm11, %v597_v20, 0.0  ;;  %648 = vst [vmem:[#allocation4 + $0x70] sm:$0xff] %v637_v59  ;;  %649 = vst [vmem:[#allocation4 + $0x78] sm:$0xff] %v638_v60  ;;  %v699_v35 = vsel %vm1667_vm11, %v689_v36, 0.0  ;;  %v700_v7 = vsel %vm1683_vm14, %v690_v55, 0.0 }
 0x104   :  { %v608_v62 = vsel %vm1683_vm14, %v598_v56, 0.0  ;;  %617 = vst [vmem:[#allocation4 + $0x20] sm:$0xff] %v607_v24  ;;  %v668_v39 = vsel %vm1667_vm11, %v658_v37, 0.0  ;;  %710 = vst [vmem:[#allocation4 + $0x110] sm:$0xff] %v699_v35  ;;  %v782_v9 = vcvt.f32.s32 %v1656_v12  ;;  %v784_v57 = vcvt.f32.s32 %v1660_v53 }
 0x105   :  { %618 = vst [vmem:[#allocation4 + $0x28] sm:$0xff] %v608_v62  ;;  %v669_v8 = vsel %vm1683_vm14, %v659_v15, 0.0  ;;  %711 = vst [vmem:[#allocation4 + $0x118] sm:$0xff] %v700_v7  ;;  %v527_v54 = vmul.u32 16, %v1265_v32  ;;  %v528_v13 = vmul.u32 16, %v1270_v29  ;;  %v436_v33 = vsub.f32 1.0, %v1625_v17 }
 0x106   :  { %679 = vst [vmem:[#allocation4 + $0xc0] sm:$0xff] %v668_v39  ;;  %680 = vst [vmem:[#allocation4 + $0xc8] sm:$0xff] %v669_v8  ;;  %vm356_vm3 = vcmp.ge.s32.totalorder %v782_v9, 15  ;;  %vm357_vm8 = vcmp.ge.s32.totalorder %v784_v57, 15  ;;  %v366_v41 = vadd.s32 1, %v782_v9  ;;  %v367_v47 = vadd.s32 1, %v784_v57 }
 0x107   :  { %v437_v23 = vsub.f32 1.0, %v1630_v58  ;;  %v386_v32 = vsel %vm356_vm3, 15, %v782_v9  ;;  %v387_v29 = vsel %vm357_vm8, 15, %v784_v57 }
 0x108   :  { %v376_v12 = vsel %vm356_vm3, 15, %v366_v41  ;;  %v377_v53 = vsel %vm357_vm8, 15, %v367_v47  ;;  %v396_v63 = vcvt.s32.f32 %v386_v32  ;;  %v397_v18 = vcvt.s32.f32 %v387_v29 }
 0x109   :  { %v466_v0 = vadd.s32 %v456_v10, %v386_v32  ;;  %v467_v5 = vadd.s32 %v457_v22, %v387_v29  ;;  %v496_v26 = vadd.s32 %v456_v10, %v376_v12  ;;  %v497_v6 = vadd.s32 %v457_v22, %v377_v53 }
 0x10a   :  { %v406_v43 = vsel %vm356_vm3, %v396_v63, %v266_v34  ;;  %v407_v4 = vsel %vm357_vm8, %v397_v18, %v267_v50  ;;  %v537_v38 = vadd.s32 %v527_v54, %v386_v32  ;;  %v538_v48 = vadd.s32 %v528_v13, %v387_v29 }
 0x10b   :  { %v426_v27 = vsub.f32 %v406_v43, %v396_v63  ;;  %v427_v10 = vsub.f32 %v407_v4, %v397_v18  ;;  %v476_v14 = vsel %vm1773_vm9, %v466_v0, 0  ;;  %v477_v22 = vsel %vm1786_vm10, %v467_v5, 0 }
 0x10c   :  { %486 = vst [vmem:[#allocation2 + $0x30] sm:$0xff] %v476_v14  ;;  %487 = vst [vmem:[#allocation2 + $0x38] sm:$0xff] %v477_v22  ;;  %v506_v61 = vsel %vm1773_vm9, %v496_v26, 0  ;;  %v507_v52 = vsel %vm1786_vm10, %v497_v6, 0  ;;  %v547_v34 = vsel %vm1773_vm9, %v537_v38, 0  ;;  %v548_v50 = vsel %vm1786_vm10, %v538_v48, 0 }
 0x10d   :  { %v446_v45 = vsub.f32 1.0, %v426_v27  ;;  %v447_v1 = vsub.f32 1.0, %v427_v10  ;;  %517 = vst [vmem:[#allocation2 + $0x80] sm:$0xff] %v506_v61  ;;  %518 = vst [vmem:[#allocation2 + $0x88] sm:$0xff] %v507_v52  ;;  %v568_v11 = vadd.s32 %v527_v54, %v376_v12  ;;  %v569_v30 = vadd.s32 %v528_v13, %v377_v53 }
 0x10e   :  { %558 = vst [vmem:[#allocation2 + $0xd0] sm:$0xff] %v547_v34  ;;  %559 = vst [vmem:[#allocation2 + $0xd8] sm:$0xff] %v548_v50  ;;  %v629_v31 = vmul.f32 %v436_v33, %v426_v27  ;;  %v630_v28 = vmul.f32 %v437_v23, %v427_v10  ;;  %v691_v40 = vmul.f32 %v426_v27, %v1625_v17 }
 0x10f   :  { %v692_v46 = vmul.f32 %v427_v10, %v1630_v58  ;;  %v578_v44 = vsel %vm1773_vm9, %v568_v11, 0  ;;  %v579_v16 = vsel %vm1786_vm10, %v569_v30, 0  ;;  %v599_v2 = vmul.f32 %v446_v45, %v436_v33 }
 0x110   :  { %v600_v51 = vmul.f32 %v447_v1, %v437_v23  ;;  %589 = vst [vmem:[#allocation2 + $0x120] sm:$0xff] %v578_v44  ;;  %590 = vst [vmem:[#allocation2 + $0x128] sm:$0xff] %v579_v16  ;;  %v639_v36 = vsel %vm1773_vm9, %v629_v31, 0.0  ;;  %v640_v55 = vsel %vm1786_vm10, %v630_v28, 0.0  ;;  %v660_v21 = vmul.f32 %v446_v45, %v1625_v17 }
 0x111   :  { %v661_v3 = vmul.f32 %v447_v1, %v1630_v58  ;;  %v609_v49 = vsel %vm1773_vm9, %v599_v2, 0.0  ;;  %650 = vst [vmem:[#allocation4 + $0x80] sm:$0xff] %v639_v36  ;;  %651 = vst [vmem:[#allocation4 + $0x88] sm:$0xff] %v640_v55  ;;  %v701_v42 = vsel %vm1773_vm9, %v691_v40, 0.0  ;;  %v702_v56 = vsel %vm1786_vm10, %v692_v46, 0.0 }
 0x112   :  { %v610_v20 = vsel %vm1786_vm10, %v600_v51, 0.0 }
 0x113   :  { %817 = shalt.err (!%p814_p4)
}
 0x114   :  { %s818_s4 = scalar_lea.hbm %s1872_s2, 5120 }
 0x115   :  { %p819_p5 = scmp.ne.s32.totalorder %s1872_s2, %s818_s4  ;;  %p822_p6 = scmp.lt.u32.totalorder %s818_s4, %s1872_s2 }
 0x117   :  { %p824_p7 = pnand %p822_p6, %p819_p5 }
 0x119   :  { %827 = shalt.err (!%p824_p7)
}
 0x11a   :  { %s861_s9 = smov 256   ;;  %s862_s10 = smov 16   ;;  %619 = vst [vmem:[#allocation4 + $0x30] sm:$0xff] %v609_v49  ;;  %620 = vst [vmem:[#allocation4 + $0x38] sm:$0xff] %v610_v20  ;;  %v670_v17 = vsel %vm1773_vm9, %v660_v21, 0.0  ;;  %v671_v58 = vsel %vm1786_vm10, %v661_v3, 0.0 }
 0x11b   :  { %727 = dma.vmem_to_hbm [thread:$0]  %s1810_s25, 5120, %s1872_s2, [#allocation3], %s861_s9, %s861_s9, %s862_s10   ;;  %712 = vst [vmem:[#allocation4 + $0x120] sm:$0xff] %v701_v42  ;;  %713 = vst [vmem:[#allocation4 + $0x128] sm:$0xff] %v702_v56 }
 0x11c   :  { %681 = vst [vmem:[#allocation4 + $0xd0] sm:$0xff] %v670_v17  ;;  %682 = vst [vmem:[#allocation4 + $0xd8] sm:$0xff] %v671_v58  ;;  %s828_s13 = scalar_lea.vmem %s1822_s27, 5120  ;;  %p833_p9 = scmp.lt.s32.totalorder %s1822_s27, %s1822_s27 }
 0x11d   :  { %p829_p8 = scmp.ne.s32.totalorder %s1822_s27, %s828_s13  ;;  %p834_p10 = scmp.lt.s32.totalorder %s828_s13, %s828_s13 }
 0x11f   :  { %p835_p11 = por %p834_p10, %p833_p9 }
 0x121   :  { %p836_p12 = pnand %p835_p11, %p829_p8 }
 0x123   :  { %839 = shalt.err (!%p836_p12)
}
 0x124   :  { %s840_s15 = scalar_lea.hbm %s1873_s3, 5120 }
 0x125   :  { %p841_p13 = scmp.ne.s32.totalorder %s1873_s3, %s840_s15  ;;  %p844_p0 = scmp.lt.u32.totalorder %s840_s15, %s1873_s3 }
 0x127   :  { %p846_p1 = pnand %p844_p0, %p841_p13 }
 0x129   :  { %849 = shalt.err (!%p846_p1)
}
 0x12a   :  { %739 = dma.vmem_to_hbm [thread:$0]  %s1822_s27, 5120, %s1873_s3, [#allocation5], %s861_s9, %s861_s9, %s862_s10  }
 0x12b   :  { %850 = dma.done.wait [#allocation3], 5120  }
 0x12c   :  { %851 = vsyncadd [#allocation3], 4294962176 }
 0x12d   :  { %852 = dma.done.wait [#allocation5], 5120  }
 0x12e   :  { %853 = vsyncadd [#allocation5], 4294962176 }
 0x12f   :  { %746 = vsyncpa [#allocation3], 1 }
 0x130   :  { %747 = vsyncpa [#allocation5], 1 }

</bundles_post_ra>
